<compile_context>
chip_gen: v7x
topology: tpu7x:2x2x1
jax: 0.10.0
libtpu: 0.0.40
codegen_flags: <defaults>
</compile_context>

<pallas_src>
import numpy as np
import jax
import jax.numpy as jnp
from jax.experimental import pallas as pl
from jax.experimental.pallas import tpu as pltpu


# ----------------------------- JPEG constants -------------------------------

_Q_LUMA = np.array([
    [16, 11, 10, 16, 24, 40, 51, 61],
    [12, 12, 14, 19, 26, 58, 60, 55],
    [14, 13, 16, 24, 40, 57, 69, 56],
    [14, 17, 22, 29, 51, 87, 80, 62],
    [18, 22, 37, 56, 68, 109, 103, 77],
    [24, 35, 55, 64, 81, 104, 113, 92],
    [49, 64, 78, 87, 103, 121, 120, 101],
    [72, 92, 95, 98, 112, 100, 103, 99],
], dtype=np.float64)

_Q_CHROMA = np.array([
    [17, 18, 24, 47, 99, 99, 99, 99],
    [18, 21, 26, 66, 99, 99, 99, 99],
    [24, 26, 56, 99, 99, 99, 99, 99],
    [47, 66, 99, 99, 99, 99, 99, 99],
    [99, 99, 99, 99, 99, 99, 99, 99],
    [99, 99, 99, 99, 99, 99, 99, 99],
    [99, 99, 99, 99, 99, 99, 99, 99],
    [99, 99, 99, 99, 99, 99, 99, 99],
], dtype=np.float64)

PACK = 2                    # flattened 8x8 blocks packed per row -> lane dim 128
LANES = 64 * PACK           # 128: full vreg lane width -> unmasked stores
TILE_ROWS = 2048            # rows per grid step (sweepable 1024..4096)
VMEM_LIMIT_BYTES = 48 << 20 # peak use ~20-25 MiB; under physical VMEM on all gens


def _cdiv(a, b):
    return -(-a // b)


def _round_up(v, m):
    return _cdiv(v, m) * m


def _scaled_qtable(base, quality):
    quality = int(np.clip(quality, 1, 100))
    scale = 5000.0 / quality if quality < 50 else 200.0 - 2.0 * quality
    q = np.floor((base * scale + 50.0) / 100.0)
    return np.clip(q, 1.0, 255.0)


def _dct8_matrix():
    k = np.arange(8, dtype=np.float64)[:, None]
    n = np.arange(8, dtype=np.float64)[None, :]
    d = np.cos((2.0 * n + 1.0) * k * np.pi / 16.0)
    return d * np.where(k == 0, np.sqrt(1.0 / 8.0), np.sqrt(2.0 / 8.0))


def _make_dct_quant_matrices(quality):
    """(2,128,128) forward / inverse DCT matrices with the quant tables folded in.

    One tile row holds PACK=2 row-major-flattened 8x8 blocks.  For a single
    block x_flat (row vector):
        levels  = round(x_row @ fwd64)   fwd64 = kron(D,D)^T * (1/q)[None,:]
        decoded = levels @ inv64         inv64 = q[:,None]   * kron(D,D)
    block-diag'ed PACK times.  Index 0 = luma table, index 1 = chroma table.
    """
    d = _dct8_matrix()
    m64 = np.kron(d, d)                         # (64,64), orthonormal
    fwd_all, inv_all = [], []
    for base in (_Q_LUMA, _Q_CHROMA):
        q = _scaled_qtable(base, quality).reshape(64)
        fwd64 = m64.T * (1.0 / q)[None, :]
        inv64 = q[:, None] * m64
        fwd = np.zeros((LANES, LANES), np.float32)
        inv = np.zeros((LANES, LANES), np.float32)
        for p in range(PACK):
            s = slice(p * 64, (p + 1) * 64)
            fwd[s, s] = fwd64
            inv[s, s] = inv64
        fwd_all.append(fwd)
        inv_all.append(inv)
    return jnp.asarray(np.stack(fwd_all)), jnp.asarray(np.stack(inv_all))


# ------------------------------- Pallas kernel -------------------------------

def _jpeg_kernel(rgb_ref, mf_ref, mi_ref, out_ref):
    # rgb_ref: (3, tile, 128) raw RGB in [0,1]; out_ref: (3, tile, 128) in [0,1]
    # mf_ref/mi_ref: (2, 128, 128) quant-folded forward/inverse DCT (0=luma,1=chroma)

    # clamp(0,1) * 255 -> uint8 (truncation == floor for non-negative values)
    r = jnp.floor(jnp.clip(rgb_ref[0], 0.0, 1.0) * 255.0)
    g = jnp.floor(jnp.clip(rgb_ref[1], 0.0, 1.0) * 255.0)
    b = jnp.floor(jnp.clip(rgb_ref[2], 0.0, 1.0) * 255.0)

    # Encoder colour transform; samples rounded/clamped to 8 bits, level-shifted.
    y = jnp.clip(jnp.round(0.299 * r + 0.587 * g + 0.114 * b), 0.0, 255.0) - 128.0
    cb = jnp.clip(jnp.round(-0.168736 * r - 0.331264 * g + 0.5 * b + 128.0),
                  0.0, 255.0) - 128.0
    cr = jnp.clip(jnp.round(0.5 * r - 0.418688 * g - 0.081312 * b + 128.0),
                  0.0, 255.0) - 128.0

    def roundtrip(x, tbl):
        # DCT + quantize (1/q folded into mf), dequant + iDCT (q folded into mi),
        # un-level-shift, round + clamp to the decoder's 8-bit sample range.
        lev = jnp.round(jnp.dot(x, mf_ref[tbl], preferred_element_type=jnp.float32))
        rec = jnp.dot(lev, mi_ref[tbl], preferred_element_type=jnp.float32)
        return jnp.clip(jnp.round(rec) + 128.0, 0.0, 255.0)

    yd = roundtrip(y, 0)
    cbd = roundtrip(cb, 1) - 128.0
    crd = roundtrip(cr, 1) - 128.0

    # Decoder colour transform back to 8-bit RGB, then /255.
    inv255 = jnp.float32(1.0 / 255.0)
    out_ref[0] = jnp.clip(jnp.round(yd + 1.402 * crd), 0.0, 255.0) * inv255
    out_ref[1] = jnp.clip(jnp.round(yd - 0.344136 * cbd - 0.714136 * crd),
                          0.0, 255.0) * inv255
    out_ref[2] = jnp.clip(jnp.round(yd + 1.772 * cbd), 0.0, 255.0) * inv255


def _jpeg_blocks_pallas(packed, m_fwd, m_inv, tile):
    c, rows_pad, lanes = packed.shape
    tpc = rows_pad // tile
    return pl.pallas_call(
        _jpeg_kernel,
        out_shape=jax.ShapeDtypeStruct((c, rows_pad, lanes), jnp.float32),
        grid_spec=pltpu.PrefetchScalarGridSpec(
            num_scalar_prefetch=0,
            grid=(tpc,),
            in_specs=[
                pl.BlockSpec((3, tile, lanes), lambda t: (0, t, 0)),
                pl.BlockSpec((2, lanes, lanes), lambda t: (0, 0, 0)),  # resident
                pl.BlockSpec((2, lanes, lanes), lambda t: (0, 0, 0)),  # resident
            ],
            out_specs=pl.BlockSpec((3, tile, lanes), lambda t: (0, t, 0)),
        ),
        compiler_params=pltpu.CompilerParams(
            dimension_semantics=("parallel",),
            vmem_limit_bytes=VMEM_LIMIT_BYTES),
    )(packed, m_fwd, m_inv)


def _choose_tiling(rows, tile_rows):
    rows8 = _round_up(max(rows, 1), 8)
    tpc = _cdiv(rows8, tile_rows)
    if tpc > 1 and tpc % 2 == 1:
        tpc += 1                       # even grid so v7x's two TCs split evenly
    tile = _round_up(_cdiv(rows8, tpc), 8)
    return tile, tile * tpc


# ------------------------------- forward pass --------------------------------

def jpeg_compression(x, quality=10, tile_rows=TILE_ROWS):
    """Equivalent of JPEGCompression.forward for NCHW RGB float input in [0,1]."""
    orig_dtype = x.dtype
    n, c, h, w = x.shape
    assert c == 3 and h % 8 == 0 and w % 8 == 0, "RGB input, H/W multiples of 8"

    xf = x.astype(jnp.float32)

    # blockify -> (3, NB, 64): each row is one row-major flattened 8x8 block.
    # TODO(synk): fold this strided transpose (and its inverse) into the kernel
    # by reading (8, W) strips and rearranging in VMEM; kept in XLA for safety.
    hb, wb = h // 8, w // 8
    nb = n * hb * wb
    blocks = xf.reshape(n, 3, hb, 8, wb, 8).transpose(1, 0, 2, 4, 3, 5)
    blocks = blocks.reshape(3, nb, 64)

    # pack PACK blocks per row (lane dim 128) and pad rows to a tile multiple.
    rows = _cdiv(nb, PACK)
    tile, rows_pad = _choose_tiling(rows, tile_rows)
    nb_pad = rows_pad * PACK
    if nb_pad != nb:
        blocks = jnp.pad(blocks, ((0, 0), (0, nb_pad - nb), (0, 0)))
    packed = blocks.reshape(3, rows_pad, LANES)

    m_fwd, m_inv = _make_dct_quant_matrices(quality)

    # Fused kernel: everything from clamp*255 to the final /255 happens inside.
    rec = _jpeg_blocks_pallas(packed, m_fwd, m_inv, tile)

    # drop padding + un-blockify -> (N, 3, H, W); values already final [0,1] RGB.
    rec = rec.reshape(3, nb_pad, 64)[:, :nb]
    rec = rec.reshape(3, n, hb, wb, 8, 8).transpose(1, 0, 2, 4, 3, 5)
    return rec.reshape(n, 3, h, w).astype(orig_dtype)


# ----------------------------------- main ------------------------------------

if __name__ == "__main__":
    key = jax.random.PRNGKey(0)
    x = jax.random.uniform(key, (2, 3, 16, 16), dtype=jnp.float32)

    out = jax.jit(lambda t: jpeg_compression(t, quality=10))(x)
    out = jax.block_until_ready(out)

    assert out.shape == x.shape and out.dtype == x.dtype
    assert bool(jnp.all(jnp.isfinite(out)))
    assert bool(jnp.all((out >= 0.0) & (out <= 1.0)))
    print("KERNEL_OK")
</pallas_src>

<mosaic_0001>
module attributes {stable_mosaic.version = 11 : i64} {
  func.func @_jpeg_kernel(%arg0: i32, %arg1: memref<3x8x128xf32, #tpu.memory_space<vmem>>, %arg2: memref<2x128x128xf32, #tpu.memory_space<vmem>>, %arg3: memref<2x128x128xf32, #tpu.memory_space<vmem>>, %arg4: memref<3x8x128xf32, #tpu.memory_space<vmem>>) attributes {dimension_semantics = [#tpu.dimension_semantics<parallel>], iteration_bounds = array<i64: 1>, scalar_prefetch = 0 : i64, scratch_operands = 0 : i64, tpu.core_type = #tpu.core_type<tc>, window_params = [{transform_indices = @transform_0, window_bounds = array<i64: 3, 8, 128>}, {pipeline_mode = #tpu.pipeline_mode<synchronous>, transform_indices = @transform_1, window_bounds = array<i64: 2, 128, 128>}, {pipeline_mode = #tpu.pipeline_mode<synchronous>, transform_indices = @transform_2, window_bounds = array<i64: 2, 128, 128>}, {transform_indices = @transform_3, window_bounds = array<i64: 3, 8, 128>}]} {
    %c0 = arith.constant 0 : index
    %c0_0 = arith.constant 0 : index
    %c0_1 = arith.constant 0 : index
    %0 = vector.load %arg1[%c0, %c0_0, %c0_1] : memref<3x8x128xf32, #tpu.memory_space<vmem>>, vector<1x8x128xf32>
    %1 = vector.shape_cast %0 : vector<1x8x128xf32> to vector<8x128xf32>
    %cst = arith.constant 0.000000e+00 : f32
    %cst_2 = arith.constant 1.000000e+00 : f32
    %2 = vector.broadcast %cst : f32 to vector<8x128xf32>
    %3 = arith.maximumf %2, %1 : vector<8x128xf32>
    %4 = vector.broadcast %cst_2 : f32 to vector<8x128xf32>
    %5 = arith.minimumf %4, %3 : vector<8x128xf32>
    %cst_3 = arith.constant 2.550000e+02 : f32
    %6 = vector.broadcast %cst_3 : f32 to vector<8x128xf32>
    %7 = arith.mulf %5, %6 : vector<8x128xf32>
    %8 = math.floor %7 : vector<8x128xf32>
    %c1 = arith.constant 1 : index
    %c0_4 = arith.constant 0 : index
    %c0_5 = arith.constant 0 : index
    %9 = vector.load %arg1[%c1, %c0_4, %c0_5] : memref<3x8x128xf32, #tpu.memory_space<vmem>>, vector<1x8x128xf32>
    %10 = vector.shape_cast %9 : vector<1x8x128xf32> to vector<8x128xf32>
    %cst_6 = arith.constant 0.000000e+00 : f32
    %cst_7 = arith.constant 1.000000e+00 : f32
    %11 = vector.broadcast %cst_6 : f32 to vector<8x128xf32>
    %12 = arith.maximumf %11, %10 : vector<8x128xf32>
    %13 = vector.broadcast %cst_7 : f32 to vector<8x128xf32>
    %14 = arith.minimumf %13, %12 : vector<8x128xf32>
    %cst_8 = arith.constant 2.550000e+02 : f32
    %15 = vector.broadcast %cst_8 : f32 to vector<8x128xf32>
    %16 = arith.mulf %14, %15 : vector<8x128xf32>
    %17 = math.floor %16 : vector<8x128xf32>
    %c2 = arith.constant 2 : index
    %c0_9 = arith.constant 0 : index
    %c0_10 = arith.constant 0 : index
    %18 = vector.load %arg1[%c2, %c0_9, %c0_10] : memref<3x8x128xf32, #tpu.memory_space<vmem>>, vector<1x8x128xf32>
    %19 = vector.shape_cast %18 : vector<1x8x128xf32> to vector<8x128xf32>
    %cst_11 = arith.constant 0.000000e+00 : f32
    %cst_12 = arith.constant 1.000000e+00 : f32
    %20 = vector.broadcast %cst_11 : f32 to vector<8x128xf32>
    %21 = arith.maximumf %20, %19 : vector<8x128xf32>
    %22 = vector.broadcast %cst_12 : f32 to vector<8x128xf32>
    %23 = arith.minimumf %22, %21 : vector<8x128xf32>
    %cst_13 = arith.constant 2.550000e+02 : f32
    %24 = vector.broadcast %cst_13 : f32 to vector<8x128xf32>
    %25 = arith.mulf %23, %24 : vector<8x128xf32>
    %26 = math.floor %25 : vector<8x128xf32>
    %cst_14 = arith.constant 2.990000e-01 : f32
    %27 = vector.broadcast %cst_14 : f32 to vector<8x128xf32>
    %28 = arith.mulf %27, %8 : vector<8x128xf32>
    %cst_15 = arith.constant 5.870000e-01 : f32
    %29 = vector.broadcast %cst_15 : f32 to vector<8x128xf32>
    %30 = arith.mulf %29, %17 : vector<8x128xf32>
    %31 = arith.addf %28, %30 : vector<8x128xf32>
    %cst_16 = arith.constant 1.140000e-01 : f32
    %32 = vector.broadcast %cst_16 : f32 to vector<8x128xf32>
    %33 = arith.mulf %32, %26 : vector<8x128xf32>
    %34 = arith.addf %31, %33 : vector<8x128xf32>
    %35 = math.roundeven %34 : vector<8x128xf32>
    %cst_17 = arith.constant 0.000000e+00 : f32
    %cst_18 = arith.constant 2.550000e+02 : f32
    %36 = vector.broadcast %cst_17 : f32 to vector<8x128xf32>
    %37 = arith.maximumf %36, %35 : vector<8x128xf32>
    %38 = vector.broadcast %cst_18 : f32 to vector<8x128xf32>
    %39 = arith.minimumf %38, %37 : vector<8x128xf32>
    %cst_19 = arith.constant 1.280000e+02 : f32
    %40 = vector.broadcast %cst_19 : f32 to vector<8x128xf32>
    %41 = arith.subf %39, %40 : vector<8x128xf32>
    %cst_20 = arith.constant -1.687360e-01 : f32
    %42 = vector.broadcast %cst_20 : f32 to vector<8x128xf32>
    %43 = arith.mulf %42, %8 : vector<8x128xf32>
    %cst_21 = arith.constant 3.312640e-01 : f32
    %44 = vector.broadcast %cst_21 : f32 to vector<8x128xf32>
    %45 = arith.mulf %44, %17 : vector<8x128xf32>
    %46 = arith.subf %43, %45 : vector<8x128xf32>
    %cst_22 = arith.constant 5.000000e-01 : f32
    %47 = vector.broadcast %cst_22 : f32 to vector<8x128xf32>
    %48 = arith.mulf %47, %26 : vector<8x128xf32>
    %49 = arith.addf %46, %48 : vector<8x128xf32>
    %cst_23 = arith.constant 1.280000e+02 : f32
    %50 = vector.broadcast %cst_23 : f32 to vector<8x128xf32>
    %51 = arith.addf %49, %50 : vector<8x128xf32>
    %52 = math.roundeven %51 : vector<8x128xf32>
    %cst_24 = arith.constant 0.000000e+00 : f32
    %cst_25 = arith.constant 2.550000e+02 : f32
    %53 = vector.broadcast %cst_24 : f32 to vector<8x128xf32>
    %54 = arith.maximumf %53, %52 : vector<8x128xf32>
    %55 = vector.broadcast %cst_25 : f32 to vector<8x128xf32>
    %56 = arith.minimumf %55, %54 : vector<8x128xf32>
    %cst_26 = arith.constant 1.280000e+02 : f32
    %57 = vector.broadcast %cst_26 : f32 to vector<8x128xf32>
    %58 = arith.subf %56, %57 : vector<8x128xf32>
    %cst_27 = arith.constant 5.000000e-01 : f32
    %59 = vector.broadcast %cst_27 : f32 to vector<8x128xf32>
    %60 = arith.mulf %59, %8 : vector<8x128xf32>
    %cst_28 = arith.constant 4.186880e-01 : f32
    %61 = vector.broadcast %cst_28 : f32 to vector<8x128xf32>
    %62 = arith.mulf %61, %17 : vector<8x128xf32>
    %63 = arith.subf %60, %62 : vector<8x128xf32>
    %cst_29 = arith.constant 8.131200e-02 : f32
    %64 = vector.broadcast %cst_29 : f32 to vector<8x128xf32>
    %65 = arith.mulf %64, %26 : vector<8x128xf32>
    %66 = arith.subf %63, %65 : vector<8x128xf32>
    %cst_30 = arith.constant 1.280000e+02 : f32
    %67 = vector.broadcast %cst_30 : f32 to vector<8x128xf32>
    %68 = arith.addf %66, %67 : vector<8x128xf32>
    %69 = math.roundeven %68 : vector<8x128xf32>
    %cst_31 = arith.constant 0.000000e+00 : f32
    %cst_32 = arith.constant 2.550000e+02 : f32
    %70 = vector.broadcast %cst_31 : f32 to vector<8x128xf32>
    %71 = arith.maximumf %70, %69 : vector<8x128xf32>
    %72 = vector.broadcast %cst_32 : f32 to vector<8x128xf32>
    %73 = arith.minimumf %72, %71 : vector<8x128xf32>
    %cst_33 = arith.constant 1.280000e+02 : f32
    %74 = vector.broadcast %cst_33 : f32 to vector<8x128xf32>
    %75 = arith.subf %73, %74 : vector<8x128xf32>
    %c0_34 = arith.constant 0 : index
    %c0_35 = arith.constant 0 : index
    %c0_36 = arith.constant 0 : index
    %76 = vector.load %arg2[%c0_34, %c0_35, %c0_36] : memref<2x128x128xf32, #tpu.memory_space<vmem>>, vector<1x128x128xf32>
    %77 = vector.shape_cast %76 : vector<1x128x128xf32> to vector<128x128xf32>
    %cst_37 = arith.constant dense<0.000000e+00> : vector<8x128xf32>
    %78 = tpu.matmul %41, %77, %cst_37 {dimension_numbers = #tpu.dot_dimension_numbers<[1], [0], [0], [1], [0, 0, 1, 1], [], []>} : vector<8x128xf32>, vector<128x128xf32>, vector<8x128xf32> -> vector<8x128xf32>
    %79 = math.roundeven %78 : vector<8x128xf32>
    %c0_38 = arith.constant 0 : index
    %c0_39 = arith.constant 0 : index
    %c0_40 = arith.constant 0 : index
    %80 = vector.load %arg3[%c0_38, %c0_39, %c0_40] : memref<2x128x128xf32, #tpu.memory_space<vmem>>, vector<1x128x128xf32>
    %81 = vector.shape_cast %80 : vector<1x128x128xf32> to vector<128x128xf32>
    %cst_41 = arith.constant dense<0.000000e+00> : vector<8x128xf32>
    %82 = tpu.matmul %79, %81, %cst_41 {dimension_numbers = #tpu.dot_dimension_numbers<[1], [0], [0], [1], [0, 0, 1, 1], [], []>} : vector<8x128xf32>, vector<128x128xf32>, vector<8x128xf32> -> vector<8x128xf32>
    %83 = math.roundeven %82 : vector<8x128xf32>
    %cst_42 = arith.constant 1.280000e+02 : f32
    %84 = vector.broadcast %cst_42 : f32 to vector<8x128xf32>
    %85 = arith.addf %83, %84 : vector<8x128xf32>
    %cst_43 = arith.constant 0.000000e+00 : f32
    %cst_44 = arith.constant 2.550000e+02 : f32
    %86 = vector.broadcast %cst_43 : f32 to vector<8x128xf32>
    %87 = arith.maximumf %86, %85 : vector<8x128xf32>
    %88 = vector.broadcast %cst_44 : f32 to vector<8x128xf32>
    %89 = arith.minimumf %88, %87 : vector<8x128xf32>
    %c1_45 = arith.constant 1 : index
    %c0_46 = arith.constant 0 : index
    %c0_47 = arith.constant 0 : index
    %90 = vector.load %arg2[%c1_45, %c0_46, %c0_47] : memref<2x128x128xf32, #tpu.memory_space<vmem>>, vector<1x128x128xf32>
    %91 = vector.shape_cast %90 : vector<1x128x128xf32> to vector<128x128xf32>
    %cst_48 = arith.constant dense<0.000000e+00> : vector<8x128xf32>
    %92 = tpu.matmul %58, %91, %cst_48 {dimension_numbers = #tpu.dot_dimension_numbers<[1], [0], [0], [1], [0, 0, 1, 1], [], []>} : vector<8x128xf32>, vector<128x128xf32>, vector<8x128xf32> -> vector<8x128xf32>
    %93 = math.roundeven %92 : vector<8x128xf32>
    %c1_49 = arith.constant 1 : index
    %c0_50 = arith.constant 0 : index
    %c0_51 = arith.constant 0 : index
    %94 = vector.load %arg3[%c1_49, %c0_50, %c0_51] : memref<2x128x128xf32, #tpu.memory_space<vmem>>, vector<1x128x128xf32>
    %95 = vector.shape_cast %94 : vector<1x128x128xf32> to vector<128x128xf32>
    %cst_52 = arith.constant dense<0.000000e+00> : vector<8x128xf32>
    %96 = tpu.matmul %93, %95, %cst_52 {dimension_numbers = #tpu.dot_dimension_numbers<[1], [0], [0], [1], [0, 0, 1, 1], [], []>} : vector<8x128xf32>, vector<128x128xf32>, vector<8x128xf32> -> vector<8x128xf32>
    %97 = math.roundeven %96 : vector<8x128xf32>
    %cst_53 = arith.constant 1.280000e+02 : f32
    %98 = vector.broadcast %cst_53 : f32 to vector<8x128xf32>
    %99 = arith.addf %97, %98 : vector<8x128xf32>
    %cst_54 = arith.constant 0.000000e+00 : f32
    %cst_55 = arith.constant 2.550000e+02 : f32
    %100 = vector.broadcast %cst_54 : f32 to vector<8x128xf32>
    %101 = arith.maximumf %100, %99 : vector<8x128xf32>
    %102 = vector.broadcast %cst_55 : f32 to vector<8x128xf32>
    %103 = arith.minimumf %102, %101 : vector<8x128xf32>
    %cst_56 = arith.constant 1.280000e+02 : f32
    %104 = vector.broadcast %cst_56 : f32 to vector<8x128xf32>
    %105 = arith.subf %103, %104 : vector<8x128xf32>
    %c1_57 = arith.constant 1 : index
    %c0_58 = arith.constant 0 : index
    %c0_59 = arith.constant 0 : index
    %106 = vector.load %arg2[%c1_57, %c0_58, %c0_59] : memref<2x128x128xf32, #tpu.memory_space<vmem>>, vector<1x128x128xf32>
    %107 = vector.shape_cast %106 : vector<1x128x128xf32> to vector<128x128xf32>
    %cst_60 = arith.constant dense<0.000000e+00> : vector<8x128xf32>
    %108 = tpu.matmul %75, %107, %cst_60 {dimension_numbers = #tpu.dot_dimension_numbers<[1], [0], [0], [1], [0, 0, 1, 1], [], []>} : vector<8x128xf32>, vector<128x128xf32>, vector<8x128xf32> -> vector<8x128xf32>
    %109 = math.roundeven %108 : vector<8x128xf32>
    %c1_61 = arith.constant 1 : index
    %c0_62 = arith.constant 0 : index
    %c0_63 = arith.constant 0 : index
    %110 = vector.load %arg3[%c1_61, %c0_62, %c0_63] : memref<2x128x128xf32, #tpu.memory_space<vmem>>, vector<1x128x128xf32>
    %111 = vector.shape_cast %110 : vector<1x128x128xf32> to vector<128x128xf32>
    %cst_64 = arith.constant dense<0.000000e+00> : vector<8x128xf32>
    %112 = tpu.matmul %109, %111, %cst_64 {dimension_numbers = #tpu.dot_dimension_numbers<[1], [0], [0], [1], [0, 0, 1, 1], [], []>} : vector<8x128xf32>, vector<128x128xf32>, vector<8x128xf32> -> vector<8x128xf32>
    %113 = math.roundeven %112 : vector<8x128xf32>
    %cst_65 = arith.constant 1.280000e+02 : f32
    %114 = vector.broadcast %cst_65 : f32 to vector<8x128xf32>
    %115 = arith.addf %113, %114 : vector<8x128xf32>
    %cst_66 = arith.constant 0.000000e+00 : f32
    %cst_67 = arith.constant 2.550000e+02 : f32
    %116 = vector.broadcast %cst_66 : f32 to vector<8x128xf32>
    %117 = arith.maximumf %116, %115 : vector<8x128xf32>
    %118 = vector.broadcast %cst_67 : f32 to vector<8x128xf32>
    %119 = arith.minimumf %118, %117 : vector<8x128xf32>
    %cst_68 = arith.constant 1.280000e+02 : f32
    %120 = vector.broadcast %cst_68 : f32 to vector<8x128xf32>
    %121 = arith.subf %119, %120 : vector<8x128xf32>
    %cst_69 = arith.constant 1.402000e+00 : f32
    %122 = vector.broadcast %cst_69 : f32 to vector<8x128xf32>
    %123 = arith.mulf %122, %121 : vector<8x128xf32>
    %124 = arith.addf %89, %123 : vector<8x128xf32>
    %125 = math.roundeven %124 : vector<8x128xf32>
    %cst_70 = arith.constant 0.000000e+00 : f32
    %cst_71 = arith.constant 2.550000e+02 : f32
    %126 = vector.broadcast %cst_70 : f32 to vector<8x128xf32>
    %127 = arith.maximumf %126, %125 : vector<8x128xf32>
    %128 = vector.broadcast %cst_71 : f32 to vector<8x128xf32>
    %129 = arith.minimumf %128, %127 : vector<8x128xf32>
    %cst_72 = arith.constant 0.00392156886 : f32
    %130 = vector.broadcast %cst_72 : f32 to vector<8x128xf32>
    %131 = arith.mulf %129, %130 : vector<8x128xf32>
    %c0_73 = arith.constant 0 : index
    %c0_74 = arith.constant 0 : index
    %c0_75 = arith.constant 0 : index
    %132 = vector.load %arg4[%c0_73, %c0_74, %c0_75] : memref<3x8x128xf32, #tpu.memory_space<vmem>>, vector<1x8x128xf32>
    %133 = vector.shape_cast %132 : vector<1x8x128xf32> to vector<8x128xf32>
    %134 = vector.shape_cast %131 : vector<8x128xf32> to vector<1x8x128xf32>
    tpu.vector_store %arg4[%c0_73, %c0_74, %c0_75], %134 {strides = array<i32>} : memref<3x8x128xf32, #tpu.memory_space<vmem>>, vector<1x8x128xf32>,
    %cst_76 = arith.constant 3.441360e-01 : f32
    %135 = vector.broadcast %cst_76 : f32 to vector<8x128xf32>
    %136 = arith.mulf %135, %105 : vector<8x128xf32>
    %137 = arith.subf %89, %136 : vector<8x128xf32>
    %cst_77 = arith.constant 7.141360e-01 : f32
    %138 = vector.broadcast %cst_77 : f32 to vector<8x128xf32>
    %139 = arith.mulf %138, %121 : vector<8x128xf32>
    %140 = arith.subf %137, %139 : vector<8x128xf32>
    %141 = math.roundeven %140 : vector<8x128xf32>
    %cst_78 = arith.constant 0.000000e+00 : f32
    %cst_79 = arith.constant 2.550000e+02 : f32
    %142 = vector.broadcast %cst_78 : f32 to vector<8x128xf32>
    %143 = arith.maximumf %142, %141 : vector<8x128xf32>
    %144 = vector.broadcast %cst_79 : f32 to vector<8x128xf32>
    %145 = arith.minimumf %144, %143 : vector<8x128xf32>
    %cst_80 = arith.constant 0.00392156886 : f32
    %146 = vector.broadcast %cst_80 : f32 to vector<8x128xf32>
    %147 = arith.mulf %145, %146 : vector<8x128xf32>
    %c1_81 = arith.constant 1 : index
    %c0_82 = arith.constant 0 : index
    %c0_83 = arith.constant 0 : index
    %148 = vector.load %arg4[%c1_81, %c0_82, %c0_83] : memref<3x8x128xf32, #tpu.memory_space<vmem>>, vector<1x8x128xf32>
    %149 = vector.shape_cast %148 : vector<1x8x128xf32> to vector<8x128xf32>
    %150 = vector.shape_cast %147 : vector<8x128xf32> to vector<1x8x128xf32>
    tpu.vector_store %arg4[%c1_81, %c0_82, %c0_83], %150 {strides = array<i32>} : memref<3x8x128xf32, #tpu.memory_space<vmem>>, vector<1x8x128xf32>,
    %cst_84 = arith.constant 1.772000e+00 : f32
    %151 = vector.broadcast %cst_84 : f32 to vector<8x128xf32>
    %152 = arith.mulf %151, %105 : vector<8x128xf32>
    %153 = arith.addf %89, %152 : vector<8x128xf32>
    %154 = math.roundeven %153 : vector<8x128xf32>
    %cst_85 = arith.constant 0.000000e+00 : f32
    %cst_86 = arith.constant 2.550000e+02 : f32
    %155 = vector.broadcast %cst_85 : f32 to vector<8x128xf32>
    %156 = arith.maximumf %155, %154 : vector<8x128xf32>
    %157 = vector.broadcast %cst_86 : f32 to vector<8x128xf32>
    %158 = arith.minimumf %157, %156 : vector<8x128xf32>
    %cst_87 = arith.constant 0.00392156886 : f32
    %159 = vector.broadcast %cst_87 : f32 to vector<8x128xf32>
    %160 = arith.mulf %158, %159 : vector<8x128xf32>
    %c2_88 = arith.constant 2 : index
    %c0_89 = arith.constant 0 : index
    %c0_90 = arith.constant 0 : index
    %161 = vector.load %arg4[%c2_88, %c0_89, %c0_90] : memref<3x8x128xf32, #tpu.memory_space<vmem>>, vector<1x8x128xf32>
    %162 = vector.shape_cast %161 : vector<1x8x128xf32> to vector<8x128xf32>
    %163 = vector.shape_cast %160 : vector<8x128xf32> to vector<1x8x128xf32>
    tpu.vector_store %arg4[%c2_88, %c0_89, %c0_90], %163 {strides = array<i32>} : memref<3x8x128xf32, #tpu.memory_space<vmem>>, vector<1x8x128xf32>,
    return
  }
  func.func @transform_0(%arg0: i32) -> (i32, i32, i32) {
    %c0_i32 = arith.constant 0 : i32
    %c0_i32_0 = arith.constant 0 : i32
    %c0_i32_1 = arith.constant 0 : i32
    return %c0_i32, %arg0, %c0_i32_0 : i32, i32, i32
  }
  func.func @transform_1(%arg0: i32) -> (i32, i32, i32) {
    %c0_i32 = arith.constant 0 : i32
    %c0_i32_0 = arith.constant 0 : i32
    %c0_i32_1 = arith.constant 0 : i32
    %c0_i32_2 = arith.constant 0 : i32
    return %c0_i32, %c0_i32_0, %c0_i32_1 : i32, i32, i32
  }
  func.func @transform_2(%arg0: i32) -> (i32, i32, i32) {
    %c0_i32 = arith.constant 0 : i32
    %c0_i32_0 = arith.constant 0 : i32
    %c0_i32_1 = arith.constant 0 : i32
    %c0_i32_2 = arith.constant 0 : i32
    return %c0_i32, %c0_i32_0, %c0_i32_1 : i32, i32, i32
  }
  func.func @transform_3(%arg0: i32) -> (i32, i32, i32) {
    %c0_i32 = arith.constant 0 : i32
    %c0_i32_0 = arith.constant 0 : i32
    %c0_i32_1 = arith.constant 0 : i32
    return %c0_i32, %arg0, %c0_i32_0 : i32, i32, i32
  }
}

</mosaic_0001>

<bundles_post_ra>
// kernel: _lambda_.1
= control target key start
LH: loop header
LB: loop body
LE: loop exit
PB: predicated region body
PF: predicated region fallthrough
CT: control target
= control target key end

     0   :  { %v1104_v0 = vmov 0.0|0.0   ;;  %vm1105_vm0 = vmmov 0   ;;  %v1106_v4 = vmov 0.0   ;;  %s1416_s1 = inlined_call_operand.vmem [shape: f32[2,128,128], index: 1, kind: input, shape index: {}]   ;;  %s1417_s0 = inlined_call_operand.vmem [shape: f32[3,8,128], index: 0, kind: input, shape index: {}]   ;;  %s1418_s2 = inlined_call_operand.vmem [shape: f32[2,128,128], index: 2, kind: input, shape index: {}]   ;;  %s1419_s3 = inlined_call_operand.vmem [shape: f32[3,8,128], index: 3, kind: output, shape index: {}]  }
   0x1   :  { %945 = vmatprep.subr.bf16.mxu0 %v1104_v0  ;;  %v60_v1 = vld [vmem:[%s1416_s1] sm:$0xff]  ;;  %v61_v2 = vld [vmem:[%s1416_s1 + $0x8] sm:$0xff]  ;;  %v62_v3 = vld [vmem:[%s1416_s1 + $0x10] sm:$0xff]  ;;  %767 = vmatprep.mubr.msk.f32.mxu0 %vm1105_vm0, %v1106_v4 }
   0x2   :  { %v946_v5 = vpack.c.bf16 %v61_v2, %v60_v1  ;;  %v63_v6 = vld [vmem:[%s1416_s1 + $0x18] sm:$0xff]  ;;  %969 = vmatprep.subr.bf16.mxu1 %v1104_v0  ;;  %802 = vmatprep.mubr.msk.f32.mxu1 %vm1105_vm0, %v1106_v4  ;;  %v64_v8 = vld [vmem:[%s1416_s1 + $0x20] sm:$0xff]  ;;  %v65_v9 = vld [vmem:[%s1416_s1 + $0x28] sm:$0xff] }
   0x3   :  { %v949_v7 = vpack.c.bf16 %v63_v6, %v62_v3  ;;  %v14_v10 = vld [vmem:[%s1417_s0] sm:$0xff]  ;;  %v592_v11 = vld [vmem:[%s1417_s0 + $0x8] sm:$0xff]  ;;  %v593_v14 = vld [vmem:[%s1417_s0 + $0x10] sm:$0xff]  ;;  %v952_v15 = vpack.c.bf16 %v65_v9, %v64_v8 }
   0x4   :  { %947 = vmatpush3.bf16.msra.mxu0 %v946_v5  ;;  %v15_v12 = vmax.f32 %v14_v10, 0.0  ;;  %v21_v13 = vmax.f32 %v592_v11, 0.0  ;;  %v27_v16 = vmax.f32 %v593_v14, 0.0  ;;  %v66_v17 = vld [vmem:[%s1416_s1 + $0x30] sm:$0xff]  ;;  %v67_v18 = vld [vmem:[%s1416_s1 + $0x38] sm:$0xff]  ;;  %v68_v25 = vld [vmem:[%s1416_s1 + $0x40] sm:$0xff] }
   0x5   :  { %948 = vmatprep.subr.bf16.mxu0 %v1104_v0  ;;  %v955_v24 = vpack.c.bf16 %v67_v18, %v66_v17  ;;  %v69_v26 = vld [vmem:[%s1416_s1 + $0x48] sm:$0xff]  ;;  %v147_v28 = vld [vmem:[%s1418_s2] sm:$0xff]  ;;  %v149_v32 = vld [vmem:[%s1418_s2 + $0x10] sm:$0xff] }
   0x6   :  { %v16_v19 = vmin.f32 %v15_v12, 1.0  ;;  %v22_v20 = vmin.f32 %v21_v13, 1.0  ;;  %v28_v21 = vmin.f32 %v27_v16, 1.0  ;;  %v148_v31 = vld [vmem:[%s1418_s2 + $0x8] sm:$0xff]  ;;  %v150_v33 = vld [vmem:[%s1418_s2 + $0x18] sm:$0xff]  ;;  %v958_v38 = vpack.c.bf16 %v69_v26, %v68_v25  ;;  %v70_v39 = vld [vmem:[%s1416_s1 + $0x50] sm:$0xff] }
   0x7   :  { %v970_v35 = vpack.c.bf16 %v148_v31, %v147_v28  ;;  %v973_v41 = vpack.c.bf16 %v150_v33, %v149_v32  ;;  %v71_v42 = vld [vmem:[%s1416_s1 + $0x58] sm:$0xff]  ;;  %v151_v44 = vld [vmem:[%s1418_s2 + $0x20] sm:$0xff]  ;;  %v152_v45 = vld [vmem:[%s1418_s2 + $0x28] sm:$0xff] }
   0x8   :  { %950 = vmatpush3.bf16.msra.mxu0 %v949_v7  ;;  %v17_v22 = vmul.f32 255.0, %v16_v19  ;;  %v23_v23 = vmul.f32 255.0, %v22_v20  ;;  %v29_v27 = vmul.f32 255.0, %v28_v21  ;;  %v961_v47 = vpack.c.bf16 %v71_v42, %v70_v39  ;;  %v72_v48 = vld [vmem:[%s1416_s1 + $0x60] sm:$0xff]  ;;  %v73_v50 = vld [vmem:[%s1416_s1 + $0x68] sm:$0xff]  ;;  %v153_v52 = vld [vmem:[%s1418_s2 + $0x30] sm:$0xff] }
   0x9   :  { %951 = vmatprep.subr.bf16.mxu0 %v1104_v0  ;;  %971 = vmatpush3.bf16.msra.mxu1 %v970_v35  ;;  %v976_v49 = vpack.c.bf16 %v152_v45, %v151_v44  ;;  %v154_v53 = vld [vmem:[%s1418_s2 + $0x38] sm:$0xff]  ;;  %v964_v55 = vpack.c.bf16 %v73_v50, %v72_v48  ;;  %v74_v56 = vld [vmem:[%s1416_s1 + $0x70] sm:$0xff]  ;;  %v155_v59 = vld [vmem:[%s1418_s2 + $0x40] sm:$0xff] }
   0xa   :  { %v1178_v29 = vfloor.f32 %v17_v22  ;;  %v1180_v30 = vfloor.f32 %v23_v23  ;;  %v1191_v34 = vfloor.f32 %v29_v27  ;;  %972 = vmatprep.subr.bf16.mxu1 %v1104_v0  ;;  %v979_v57 = vpack.c.bf16 %v154_v53, %v153_v52  ;;  %v75_v58 = vld [vmem:[%s1416_s1 + $0x78] sm:$0xff]  ;;  %v156_v60 = vld [vmem:[%s1418_s2 + $0x48] sm:$0xff]  ;;  %v597_v1 = vld [vmem:[%s1416_s1 + $0x80] sm:$0xff] }
   0xb   :  { %v967_v62 = vpack.c.bf16 %v75_v58, %v74_v56  ;;  %v982_v63 = vpack.c.bf16 %v156_v60, %v155_v59  ;;  %v598_v2 = vld [vmem:[%s1416_s1 + $0x88] sm:$0xff]  ;;  %v157_v3 = vld [vmem:[%s1418_s2 + $0x50] sm:$0xff]  ;;  %v158_v5 = vld [vmem:[%s1418_s2 + $0x58] sm:$0xff] }
   0xc   :  { %953 = vmatpush3.bf16.msra.mxu0 %v952_v15  ;;  %v31_v36 = vmul.f32 0.299, %v1178_v29  ;;  %v32_v37 = vmul.f32 0.587, %v1180_v30  ;;  %v34_v40 = vmul.f32 0.114, %v1191_v34  ;;  %v1252_v7 = vpack.c.bf16 %v598_v2, %v597_v1 }
   0xd   :  { %954 = vmatprep.subr.bf16.mxu0 %v1104_v0  ;;  %974 = vmatpush3.bf16.msra.mxu1 %v973_v41  ;;  %v599_v8 = vld [vmem:[%s1416_s1 + $0x90] sm:$0xff]  ;;  %v600_v9 = vld [vmem:[%s1416_s1 + $0x98] sm:$0xff]  ;;  %v985_v10 = vpack.c.bf16 %v158_v5, %v157_v3  ;;  %v159_v11 = vld [vmem:[%s1418_s2 + $0x60] sm:$0xff]  ;;  %v40_v13 = vmul.f32 -0.168736, %v1178_v29  ;;  %v43_v20 = vmul.f32 0.5, %v1191_v34 }
   0xe   :  { %v33_v43 = vadd.f32 %v32_v37, %v31_v36  ;;  %975 = vmatprep.subr.bf16.mxu1 %v1104_v0  ;;  %v160_v12 = vld [vmem:[%s1418_s2 + $0x68] sm:$0xff]  ;;  %v41_v14 = vmul.f32 0.331264, %v1180_v30  ;;  %v997_v15 = vpack.c.bf16 %v600_v9, %v599_v8  ;;  %v601_v16 = vld [vmem:[%s1416_s1 + $0xa0] sm:$0xff]  ;;  %v603_v22 = vld [vmem:[%s1416_s1 + $0xb0] sm:$0xff] }
   0xf   :  { %v602_v17 = vld [vmem:[%s1416_s1 + $0xa8] sm:$0xff]  ;;  %v988_v18 = vpack.c.bf16 %v160_v12, %v159_v11  ;;  %v604_v23 = vld [vmem:[%s1416_s1 + $0xb8] sm:$0xff]  ;;  %v605_v26 = vld [vmem:[%s1416_s1 + $0xc0] sm:$0xff] }
  0x10   :  { %956 = vmatpush3.bf16.msra.mxu0 %v955_v24  ;;  %v35_v46 = vadd.f32 %v34_v40, %v33_v43  ;;  %v42_v19 = vsub.f32 %v40_v13, %v41_v14  ;;  %v1000_v21 = vpack.c.bf16 %v602_v17, %v601_v16  ;;  %v1003_v25 = vpack.c.bf16 %v604_v23, %v603_v22  ;;  %v606_v27 = vld [vmem:[%s1416_s1 + $0xc8] sm:$0xff]  ;;  %v607_v32 = vld [vmem:[%s1416_s1 + $0xd0] sm:$0xff]  ;;  %v608_v33 = vld [vmem:[%s1416_s1 + $0xd8] sm:$0xff] }
  0x11   :  { %957 = vmatprep.subr.bf16.mxu0 %v1104_v0  ;;  %977 = vmatpush3.bf16.msra.mxu1 %v976_v49  ;;  %v1006_v31 = vpack.c.bf16 %v606_v27, %v605_v26  ;;  %v1009_v36 = vpack.c.bf16 %v608_v33, %v607_v32  ;;  %v609_v37 = vld [vmem:[%s1416_s1 + $0xe0] sm:$0xff]  ;;  %v611_v41 = vld [vmem:[%s1416_s1 + $0xf0] sm:$0xff]  ;;  %v612_v42 = vld [vmem:[%s1416_s1 + $0xf8] sm:$0xff]  ;;  %v53_v49 = vmul.f32 0.081312, %v1191_v34 }
  0x12   :  { %v1089_v51 = vround.rtne.f32 %v35_v46  ;;  %978 = vmatprep.subr.bf16.mxu1 %v1104_v0  ;;  %v44_v24 = vadd.f32 %v43_v20, %v42_v19  ;;  %v1015_v44 = vpack.c.bf16 %v612_v42, %v611_v41  ;;  %v50_v46 = vmul.f32 0.5, %v1178_v29  ;;  %v161_v53 = vld [vmem:[%s1418_s2 + $0x70] sm:$0xff]  ;;  %v613_v56 = vld [vmem:[%s1418_s2 + $0x80] sm:$0xff]  ;;  %v618_v3 = vld [vmem:[%s1418_s2 + $0xa8] sm:$0xff] }
  0x13   :  { %v617_v2 = vld [vmem:[%s1418_s2 + $0xa0] sm:$0xff]  ;;  %v623_v12 = vld [vmem:[%s1418_s2 + $0xd0] sm:$0xff]  ;;  %v624_v13 = vld [vmem:[%s1418_s2 + $0xd8] sm:$0xff] }
  0x14   :  { %959 = vmatpush3.bf16.msra.mxu0 %v958_v38  ;;  %v37_v54 = vmax.f32 %v1089_v51, 0.0  ;;  %v45_v28 = vadd.f32 128.0, %v44_v24  ;;  %v610_v38 = vld [vmem:[%s1416_s1 + $0xe8] sm:$0xff]  ;;  %v1024_v5 = vpack.c.bf16 %v618_v3, %v617_v2  ;;  %v621_v9 = vld [vmem:[%s1418_s2 + $0xc0] sm:$0xff]  ;;  %v1033_v14 = vpack.c.bf16 %v624_v13, %v623_v12  ;;  %v628_v19 = vld [vmem:[%s1418_s2 + $0xf8] sm:$0xff] }
  0x15   :  { %960 = vmatprep.subr.bf16.mxu0 %v1104_v0  ;;  %980 = vmatpush3.bf16.msra.mxu1 %v979_v57  ;;  %v1012_v40 = vpack.c.bf16 %v610_v38, %v609_v37  ;;  %v614_v57 = vld [vmem:[%s1418_s2 + $0x88] sm:$0xff] }
  0x16   :  { %v38_v61 = vmin.f32 %v37_v54, 255.0  ;;  %981 = vmatprep.subr.bf16.mxu1 %v1104_v0  ;;  %v1090_v35 = vround.rtne.f32 %v45_v28  ;;  %v162_v54 = vld [vmem:[%s1418_s2 + $0x78] sm:$0xff]  ;;  %v1018_v59 = vpack.c.bf16 %v614_v57, %v613_v56  ;;  %v626_v16 = vld [vmem:[%s1418_s2 + $0xe8] sm:$0xff] }
  0x18   :  { %962 = vmatpush3.bf16.msra.mxu0 %v961_v47  ;;  %v594_v6 = vadd.f32 -128.0, %v38_v61  ;;  %v47_v39 = vmax.f32 %v1090_v35, 0.0  ;;  %v51_v47 = vmul.f32 0.418688, %v1180_v30 }
  0x19   :  { %963 = vmatprep.subr.bf16.mxu0 %v1104_v0  ;;  %983 = vmatpush3.bf16.msra.mxu1 %v982_v63  ;;  %v616_v63 = vld [vmem:[%s1418_s2 + $0x98] sm:$0xff] }
  0x1a   :  { %984 = vmatprep.subr.bf16.mxu1 %v1104_v0  ;;  %v48_v43 = vmin.f32 %v47_v39, 255.0  ;;  %v52_v48 = vsub.f32 %v50_v46, %v51_v47 }
  0x1c   :  { %965 = vmatpush3.bf16.msra.mxu0 %v964_v55  ;;  %v595_v45 = vadd.f32 -128.0, %v48_v43  ;;  %v54_v50 = vsub.f32 %v52_v48, %v53_v49  ;;  %v991_v55 = vpack.c.bf16 %v162_v54, %v161_v53 }
  0x1d   :  { %966 = vmatprep.subr.bf16.mxu0 %v1104_v0  ;;  %986 = vmatpush3.bf16.msra.mxu1 %v985_v10  ;;  %v622_v10 = vld [vmem:[%s1418_s2 + $0xc8] sm:$0xff] }
  0x1e   :  { %987 = vmatprep.subr.bf16.mxu1 %v1104_v0  ;;  %v55_v29 = vadd.f32 128.0, %v54_v50  ;;  %v1030_v11 = vpack.c.bf16 %v622_v10, %v621_v9 }
  0x20   :  { %968 = vmatpush3.bf16.msra.mxu0 %v967_v62  ;;  %v1091_v30 = vround.rtne.f32 %v55_v29  ;;  %v615_v62 = vld [vmem:[%s1418_s2 + $0x90] sm:$0xff] }
  0x21   :  { %993 = vmatprep.subr.bf16.mxu0 %v1104_v0  ;;  %989 = vmatpush3.bf16.msra.mxu1 %v988_v18  ;;  %v1021_v1 = vpack.c.bf16 %v616_v63, %v615_v62  ;;  %v627_v18 = vld [vmem:[%s1418_s2 + $0xf0] sm:$0xff] }
  0x22   :  { %990 = vmatprep.subr.bf16.mxu1 %v1104_v0  ;;  %v57_v51 = vmax.f32 %v1091_v30, 0.0  ;;  %v1039_v20 = vpack.c.bf16 %v628_v19, %v627_v18 }
  0x23   :  { %768 = vmatmul.mubr.f32.vlgmr.msra.gmra.mrb[0].mxu0 %v594_v6  ;;  %v619_v6 = vld [vmem:[%s1418_s2 + $0xb0] sm:$0xff] }
  0x24   :  { %995 = vmatpush3.bf16.msra.mxu0 %v1252_v7  ;;  %837 = vmatprep.mubr.msk.f32.mxu0 %vm1105_vm0, %v1106_v4  ;;  %v58_v34 = vmin.f32 %v57_v51, 255.0 }
  0x25   :  { %996 = vmatprep.subr.bf16.mxu0 %v1104_v0  ;;  %992 = vmatpush3.bf16.msra.mxu1 %v991_v55 }
  0x26   :  { %v596_v52 = vadd.f32 -128.0, %v58_v34  ;;  %1017 = vmatprep.subr.bf16.mxu1 %v1104_v0 }
  0x28   :  { %998 = vmatpush3.bf16.msra.mxu0 %v997_v15 }
  0x29   :  { %999 = vmatprep.subr.bf16.mxu0 %v1104_v0 }
  0x2c   :  { %1001 = vmatpush3.bf16.msra.mxu0 %v1000_v21 }
  0x2d   :  { %1002 = vmatprep.subr.bf16.mxu0 %v1104_v0 }
  0x30   :  { %1004 = vmatpush3.bf16.msra.mxu0 %v1003_v25 }
  0x31   :  { %1005 = vmatprep.subr.bf16.mxu0 %v1104_v0 }
  0x34   :  { %1007 = vmatpush3.bf16.msra.mxu0 %v1006_v31 }
  0x35   :  { %1008 = vmatprep.subr.bf16.mxu0 %v1104_v0 }
  0x38   :  { %1010 = vmatpush3.bf16.msra.mxu0 %v1009_v36 }
  0x39   :  { %1011 = vmatprep.subr.bf16.mxu0 %v1104_v0 }
  0x3c   :  { %1013 = vmatpush3.bf16.msra.mxu0 %v1012_v40 }
  0x3d   :  { %1014 = vmatprep.subr.bf16.mxu0 %v1104_v0 }
  0x40   :  { %1016 = vmatpush3.bf16.msra.mxu0 %v1015_v44 }
  0x41   :  { %1041 = vmatprep.subr.bf16.mxu0 %v1104_v0 }
  0x43   :  { %838 = vmatmul.mubr.f32.vlgmr.msra.gmra.mrb[2].mxu0 %v595_v45 }
  0x44   :  { %1043 = vmatpush3.bf16.msra.mxu0 %v1252_v7  ;;  %907 = vmatprep.mubr.msk.f32.mxu0 %vm1105_vm0, %v1106_v4  ;;  %v620_v7 = vld [vmem:[%s1418_s2 + $0xb8] sm:$0xff] }
  0x45   :  { %1044 = vmatprep.subr.bf16.mxu0 %v1104_v0  ;;  %v1027_v8 = vpack.c.bf16 %v620_v7, %v619_v6 }
  0x48   :  { %1046 = vmatpush3.bf16.msra.mxu0 %v997_v15  ;;  %v625_v15 = vld [vmem:[%s1418_s2 + $0xe0] sm:$0xff] }
  0x49   :  { %1047 = vmatprep.subr.bf16.mxu0 %v1104_v0  ;;  %v1036_v17 = vpack.c.bf16 %v626_v16, %v625_v15 }
  0x4c   :  { %1049 = vmatpush3.bf16.msra.mxu0 %v1000_v21 }
  0x4d   :  { %1050 = vmatprep.subr.bf16.mxu0 %v1104_v0 }
  0x50   :  { %1052 = vmatpush3.bf16.msra.mxu0 %v1003_v25 }
  0x51   :  { %1053 = vmatprep.subr.bf16.mxu0 %v1104_v0 }
  0x54   :  { %1055 = vmatpush3.bf16.msra.mxu0 %v1006_v31 }
  0x55   :  { %1056 = vmatprep.subr.bf16.mxu0 %v1104_v0 }
  0x58   :  { %1058 = vmatpush3.bf16.msra.mxu0 %v1009_v36 }
  0x59   :  { %1059 = vmatprep.subr.bf16.mxu0 %v1104_v0 }
  0x5c   :  { %1061 = vmatpush3.bf16.msra.mxu0 %v1012_v40 }
  0x5d   :  { %1062 = vmatprep.subr.bf16.mxu0 %v1104_v0 }
  0x60   :  { %1064 = vmatpush3.bf16.msra.mxu0 %v1015_v44 }
  0x63   :  { %908 = vmatmul.mubr.f32.vlgmr.msra.gmra.mrb[4].mxu0 %v596_v52 }
  0xf6   :  { %v142_v58 = vpop.f32.mrb[0].mxu0 }
  0xf7   :  { %v1092_v60 = vround.rtne.f32 %v142_v58  ;;  %v769_v61 = vpop.f32.mrb[1].mxu0 }
  0xf9   :  { %803 = vmatmul.mubr.f32.vlgmr.msra.gmra.mrb[0].mxu1 %v1092_v60 }
  0xfa   :  { %1019 = vmatpush3.bf16.msra.mxu1 %v1018_v59  ;;  %872 = vmatprep.mubr.msk.f32.mxu1 %vm1105_vm0, %v1106_v4 }
  0xfb   :  { %1020 = vmatprep.subr.bf16.mxu1 %v1104_v0 }
  0xfe   :  { %1022 = vmatpush3.bf16.msra.mxu1 %v1021_v1 }
  0xff   :  { %1023 = vmatprep.subr.bf16.mxu1 %v1104_v0 }
 0x102   :  { %1025 = vmatpush3.bf16.msra.mxu1 %v1024_v5 }
 0x103   :  { %1026 = vmatprep.subr.bf16.mxu1 %v1104_v0 }
 0x106   :  { %1028 = vmatpush3.bf16.msra.mxu1 %v1027_v8 }
 0x107   :  { %1029 = vmatprep.subr.bf16.mxu1 %v1104_v0 }
 0x10a   :  { %1031 = vmatpush3.bf16.msra.mxu1 %v1030_v11 }
 0x10b   :  { %1032 = vmatprep.subr.bf16.mxu1 %v1104_v0 }
 0x10e   :  { %1034 = vmatpush3.bf16.msra.mxu1 %v1033_v14 }
 0x10f   :  { %1035 = vmatprep.subr.bf16.mxu1 %v1104_v0 }
 0x112   :  { %1037 = vmatpush3.bf16.msra.mxu1 %v1036_v17 }
 0x113   :  { %1038 = vmatprep.subr.bf16.mxu1 %v1104_v0 }
 0x116   :  { %v320_v21 = vpop.f32.mrb[2].mxu0  ;;  %1040 = vmatpush3.bf16.msra.mxu1 %v1039_v20 }
 0x117   :  { %v1094_v22 = vround.rtne.f32 %v320_v21  ;;  %v839_v23 = vpop.f32.mrb[3].mxu0  ;;  %1065 = vmatprep.subr.bf16.mxu1 %v1104_v0 }
 0x119   :  { %873 = vmatmul.mubr.f32.vlgmr.msra.gmra.mrb[2].mxu1 %v1094_v22 }
 0x11a   :  { %1067 = vmatpush3.bf16.msra.mxu1 %v1018_v59  ;;  %942 = vmatprep.mubr.msk.f32.mxu1 %vm1105_vm0, %v1106_v4 }
 0x11b   :  { %1068 = vmatprep.subr.bf16.mxu1 %v1104_v0 }
 0x11e   :  { %1070 = vmatpush3.bf16.msra.mxu1 %v1021_v1 }
 0x11f   :  { %1071 = vmatprep.subr.bf16.mxu1 %v1104_v0 }
 0x122   :  { %1073 = vmatpush3.bf16.msra.mxu1 %v1024_v5 }
 0x123   :  { %1074 = vmatprep.subr.bf16.mxu1 %v1104_v0 }
 0x126   :  { %1076 = vmatpush3.bf16.msra.mxu1 %v1027_v8 }
 0x127   :  { %1077 = vmatprep.subr.bf16.mxu1 %v1104_v0 }
 0x12a   :  { %1079 = vmatpush3.bf16.msra.mxu1 %v1030_v11 }
 0x12b   :  { %1080 = vmatprep.subr.bf16.mxu1 %v1104_v0 }
 0x12e   :  { %1082 = vmatpush3.bf16.msra.mxu1 %v1033_v14 }
 0x12f   :  { %1083 = vmatprep.subr.bf16.mxu1 %v1104_v0 }
 0x132   :  { %1085 = vmatpush3.bf16.msra.mxu1 %v1036_v17 }
 0x133   :  { %1086 = vmatprep.subr.bf16.mxu1 %v1104_v0 }
 0x136   :  { %v483_v4 = vpop.f32.mrb[4].mxu0  ;;  %1088 = vmatpush3.bf16.msra.mxu1 %v1039_v20 }
 0x137   :  { %v1096_v24 = vround.rtne.f32 %v483_v4  ;;  %v909_v25 = vpop.f32.mrb[5].mxu0 }
 0x139   :  { %943 = vmatmul.mubr.f32.vlgmr.msra.gmra.mrb[4].mxu1 %v1096_v24 }
 0x1cc   :  { %v229_v26 = vpop.f32.mrb[0].mxu1 }
 0x1cd   :  { %v804_v27 = vpop.f32.mrb[1].mxu1  ;;  %v1093_v28 = vround.rtne.f32 %v229_v26 }
 0x1cf   :  { %v234_v35 = vadd.f32 128.0, %v1093_v28 }
 0x1d1   :  { %v235_v38 = vmax.f32 %v234_v35, 0.0 }
 0x1d3   :  { %v236_v41 = vmin.f32 %v235_v38, 255.0 }
 0x1ec   :  { %v408_v31 = vpop.f32.mrb[2].mxu1 }
 0x1ed   :  { %v1095_v32 = vround.rtne.f32 %v408_v31  ;;  %v874_v33 = vpop.f32.mrb[3].mxu1 }
 0x1ef   :  { %v413_v36 = vadd.f32 128.0, %v1095_v32 }
 0x1f1   :  { %v414_v37 = vmax.f32 %v413_v36, 0.0 }
 0x1f3   :  { %v415_v39 = vmin.f32 %v414_v37, 255.0 }
 0x1f5   :  { %v629_v40 = vadd.f32 -128.0, %v415_v39 }
 0x1f7   :  { %v570_v42 = vmul.f32 0.344136, %v629_v40  ;;  %v580_v0 = vmul.f32 1.772, %v629_v40 }
 0x1f9   :  { %v571_v43 = vsub.f32 %v236_v41, %v570_v42  ;;  %v581_v44 = vadd.f32 %v580_v0, %v236_v41 }
 0x1fb   :  { %v1100_v45 = vround.rtne.f32 %v581_v44 }
 0x1fd   :  { %v583_v46 = vmax.f32 %v1100_v45, 0.0 }
 0x1ff   :  { %v584_v47 = vmin.f32 %v583_v46, 255.0 }
 0x201   :  { %v585_v48 = vmul.f32 0.003921569, %v584_v47 }
 0x203   :  { %632 = vst [vmem:[%s1419_s3 + $0x10] sm:$0xff] %v585_v48 }
 0x20c   :  { %v554_v49 = vpop.f32.mrb[4].mxu1 }
 0x20d   :  { %v1097_v50 = vround.rtne.f32 %v554_v49  ;;  %v944_v29 = vpop.f32.mrb[5].mxu1 }
 0x20f   :  { %v559_v30 = vadd.f32 128.0, %v1097_v50 }
 0x211   :  { %v560_v51 = vmax.f32 %v559_v30, 0.0 }
 0x213   :  { %v561_v34 = vmin.f32 %v560_v51, 255.0 }
 0x215   :  { %v630_v52 = vadd.f32 -128.0, %v561_v34 }
 0x217   :  { %v563_v53 = vmul.f32 1.402, %v630_v52  ;;  %v572_v54 = vmul.f32 0.714136, %v630_v52 }
 0x219   :  { %v564_v55 = vadd.f32 %v563_v53, %v236_v41  ;;  %v573_v56 = vsub.f32 %v571_v43, %v572_v54 }
 0x21b   :  { %v1098_v57 = vround.rtne.f32 %v564_v55  ;;  %v1099_v58 = vround.rtne.f32 %v573_v56 }
 0x21d   :  { %v566_v59 = vmax.f32 %v1098_v57, 0.0  ;;  %v575_v60 = vmax.f32 %v1099_v58, 0.0 }
 0x21f   :  { %v567_v61 = vmin.f32 %v566_v59, 255.0  ;;  %v576_v62 = vmin.f32 %v575_v60, 255.0 }
 0x221   :  { %v568_v63 = vmul.f32 0.003921569, %v567_v61  ;;  %v577_v1 = vmul.f32 0.003921569, %v576_v62 }
 0x223   :  { %569 = vst [vmem:[%s1419_s3] sm:$0xff] %v568_v63  ;;  %631 = vst [vmem:[%s1419_s3 + $0x8] sm:$0xff] %v577_v1 }

</bundles_post_ra>
